<compile_context>
chip_gen: v5e
topology: v5e:2x2
jax: 0.10.0
libtpu: 0.0.40
codegen_flags: <defaults>
</compile_context>

<pallas_src>
import jax
import jax.numpy as jnp
from jax.experimental import pallas as pl
from jax.experimental.pallas import tpu as pltpu


def policy_mlp_kernel(x_ref, w1_ref, b1_ref, w2_ref, b2_ref, w3_ref, b3_ref, o_ref):
    # x_ref: (num_inputs, tb)  -- batch on lanes.
    xT = x_ref[...]

    # linear1 + tanh : (H, tb)
    h1 = jnp.tanh(
        jnp.dot(w1_ref[...], xT, preferred_element_type=jnp.float32) + b1_ref[...]
    )

    # linear2 + tanh : (H, tb)
    h2 = jnp.tanh(
        jnp.dot(w2_ref[...], h1, preferred_element_type=jnp.float32) + b2_ref[...]
    )

    # output layer : logits^T (A, tb); softmax over the action (sublane) axis.
    logits = jnp.dot(w3_ref[...], h2, preferred_element_type=jnp.float32) + b3_ref[...]
    m = jnp.max(logits, axis=0, keepdims=True)        # (1, tb)
    e = jnp.exp(logits - m)                           # (A, tb), lane-dense EUP work
    denom = jnp.sum(e, axis=0, keepdims=True)         # (1, tb)

    # EUP approximate reciprocal + one Newton-Raphson refinement (error ~1e-7).
    r = pl.reciprocal(denom, approx=True)
    r = r * (2.0 - denom * r)

    o_ref[...] = e * r                                # (A, tb), unmasked lane-dense store


def _round_up(x, m):
    return ((x + m - 1) // m) * m


def policy_network_forward(state, params, *, block_batch=4096):
    """state: (B, num_inputs) f32 -> probs: (B, num_actions) f32.

    params are in PyTorch Linear layout: weights (out_features, in_features),
    biases (out_features, 1).
    """
    w1, b1, w2, b2, w3, b3 = params
    B, num_inputs = state.shape
    A = w3.shape[0]

    # Batch-on-lanes: feed state^T; transpose the (A, B) result back at the end.
    state_t = jnp.transpose(state)                    # (num_inputs, B)

    # Balanced batch tiles, multiple of 128 lanes (or one full-B tile).
    if B <= block_batch:
        tb = B
    else:
        n_tiles = pl.cdiv(B, block_batch)
        tb = _round_up(pl.cdiv(B, n_tiles), 128)
    grid = (pl.cdiv(B, tb),)

    # Weights/biases: full-array blocks with a constant index_map -> DMA'd once,
    # resident in VMEM across every batch tile.
    def resident(a):
        nd = a.ndim
        return pl.BlockSpec(a.shape, lambda i, _nd=nd: (0,) * _nd,
                            memory_space=pltpu.VMEM)

    probs_t = pl.pallas_call(
        policy_mlp_kernel,
        out_shape=jax.ShapeDtypeStruct((A, B), jnp.float32),
        grid=grid,
        in_specs=[
            pl.BlockSpec((num_inputs, tb), lambda i: (0, i),
                         memory_space=pltpu.VMEM),    # state^T tiled over batch lanes
            resident(w1), resident(b1),
            resident(w2), resident(b2),
            resident(w3), resident(b3),
        ],
        out_specs=pl.BlockSpec((A, tb), lambda i: (0, i),
                               memory_space=pltpu.VMEM),
        compiler_params=pltpu.CompilerParams(
            dimension_semantics=("parallel",)),       # v7x: balanced tiles across 2 TCs
    )(state_t, w1, b1, w2, b2, w3, b3)

    return jnp.transpose(probs_t)                     # (B, A)


def init_params(key, num_inputs, num_actions, hidden_size):
    """PyTorch-Linear-style init (uniform +/- 1/sqrt(fan_in)).
    Weights stored as (out_features, in_features); biases as (out_features, 1)."""
    def linear(k, fan_in, fan_out):
        kw, kb = jax.random.split(k)
        bound = 1.0 / jnp.sqrt(jnp.float32(fan_in))
        w = jax.random.uniform(kw, (fan_out, fan_in), jnp.float32, -bound, bound)
        b = jax.random.uniform(kb, (fan_out, 1), jnp.float32, -bound, bound)
        return w, b

    k1, k2, k3 = jax.random.split(key, 3)
    w1, b1 = linear(k1, num_inputs, hidden_size)
    w2, b2 = linear(k2, hidden_size, hidden_size)
    w3, b3 = linear(k3, hidden_size, num_actions)
    return (w1, b1, w2, b2, w3, b3)


def reference_forward(state, params):
    w1, b1, w2, b2, w3, b3 = params
    h1 = jnp.tanh(state @ w1.T + b1.T)
    h2 = jnp.tanh(h1 @ w2.T + b2.T)
    return jax.nn.softmax(h2 @ w3.T + b3.T, axis=-1)


if __name__ == "__main__":
    # state = np.zeros(shape=43) in the source file -> num_inputs = 43
    num_inputs, num_actions, hidden_size = 43, 8, 32

    key = jax.random.PRNGKey(0)
    k_params, k_small, k_big = jax.random.split(key, 3)
    params = init_params(k_params, num_inputs, num_actions, hidden_size)

    # Small batch (matches original usage: a single/few env states). Single tile.
    batch = 2
    state_small = jax.random.normal(k_small, (batch, num_inputs), jnp.float32)
    probs = jax.block_until_ready(policy_network_forward(state_small, params))
    ref = reference_forward(state_small, params)
    assert probs.shape == (batch, num_actions)
    assert jnp.allclose(probs, ref, atol=1e-5, rtol=1e-5)
    assert jnp.allclose(jnp.sum(probs, axis=-1), 1.0, atol=1e-5)

    # Larger batch, default tiling: one balanced full-B tile (600 <= block_batch).
    big_batch = 600
    state_big = jax.random.normal(k_big, (big_batch, num_inputs), jnp.float32)
    probs_big = jax.block_until_ready(policy_network_forward(state_big, params))
    ref_big = reference_forward(state_big, params)
    assert probs_big.shape == (big_batch, num_actions)
    assert jnp.allclose(probs_big, ref_big, atol=1e-5, rtol=1e-5)
    assert jnp.allclose(jnp.sum(probs_big, axis=-1), 1.0, atol=1e-5)

    # Same batch with a small block_batch to exercise the multi-tile grid path
    # (3 tiles of 256 lanes, partial last tile) with resident weights.
    probs_tiled = jax.block_until_ready(
        policy_network_forward(state_big, params, block_batch=256))
    assert probs_tiled.shape == (big_batch, num_actions)
    assert jnp.allclose(probs_tiled, ref_big, atol=1e-5, rtol=1e-5)
    assert jnp.allclose(jnp.sum(probs_tiled, axis=-1), 1.0, atol=1e-5)

    print("KERNEL_OK")
</pallas_src>

<mosaic_0001>
module attributes {stable_mosaic.version = 11 : i64} {
  func.func @policy_mlp_kernel(%arg0: i32, %arg1: memref<43x2xf32, #tpu.memory_space<vmem>>, %arg2: memref<32x43xf32, #tpu.memory_space<vmem>>, %arg3: memref<32x1xf32, #tpu.memory_space<vmem>>, %arg4: memref<32x32xf32, #tpu.memory_space<vmem>>, %arg5: memref<32x1xf32, #tpu.memory_space<vmem>>, %arg6: memref<8x32xf32, #tpu.memory_space<vmem>>, %arg7: memref<8x1xf32, #tpu.memory_space<vmem>>, %arg8: memref<8x2xf32, #tpu.memory_space<vmem>>) attributes {dimension_semantics = [#tpu.dimension_semantics<parallel>], iteration_bounds = array<i64: 1>, scalar_prefetch = 0 : i64, scratch_operands = 0 : i64, tpu.core_type = #tpu.core_type<tc>, window_params = [{transform_indices = @transform_0, window_bounds = array<i64: 43, 2>}, {pipeline_mode = #tpu.pipeline_mode<synchronous>, transform_indices = @transform_1, window_bounds = array<i64: 32, 43>}, {pipeline_mode = #tpu.pipeline_mode<synchronous>, transform_indices = @transform_2, window_bounds = array<i64: 32, 1>}, {pipeline_mode = #tpu.pipeline_mode<synchronous>, transform_indices = @transform_3, window_bounds = array<i64: 32, 32>}, {pipeline_mode = #tpu.pipeline_mode<synchronous>, transform_indices = @transform_4, window_bounds = array<i64: 32, 1>}, {pipeline_mode = #tpu.pipeline_mode<synchronous>, transform_indices = @transform_5, window_bounds = array<i64: 8, 32>}, {pipeline_mode = #tpu.pipeline_mode<synchronous>, transform_indices = @transform_6, window_bounds = array<i64: 8, 1>}, {transform_indices = @transform_7, window_bounds = array<i64: 8, 2>}]} {
    %c0 = arith.constant 0 : index
    %c0_0 = arith.constant 0 : index
    %0 = vector.load %arg1[%c0, %c0_0] : memref<43x2xf32, #tpu.memory_space<vmem>>, vector<43x2xf32>
    %c0_1 = arith.constant 0 : index
    %c0_2 = arith.constant 0 : index
    %1 = vector.load %arg2[%c0_1, %c0_2] : memref<32x43xf32, #tpu.memory_space<vmem>>, vector<32x43xf32>
    %cst = arith.constant dense<0.000000e+00> : vector<32x2xf32>
    %2 = tpu.matmul %1, %0, %cst {dimension_numbers = #tpu.dot_dimension_numbers<[1], [0], [0], [1], [0, 0, 1, 1], [], []>} : vector<32x43xf32>, vector<43x2xf32>, vector<32x2xf32> -> vector<32x2xf32>
    %c0_3 = arith.constant 0 : index
    %c0_4 = arith.constant 0 : index
    %3 = vector.load %arg3[%c0_3, %c0_4] : memref<32x1xf32, #tpu.memory_space<vmem>>, vector<32x1xf32>
    %4 = vector.broadcast %3 : vector<32x1xf32> to vector<32x2xf32>
    %5 = arith.addf %2, %4 : vector<32x2xf32>
    %6 = math.tanh %5 : vector<32x2xf32>
    %c0_5 = arith.constant 0 : index
    %c0_6 = arith.constant 0 : index
    %7 = vector.load %arg4[%c0_5, %c0_6] : memref<32x32xf32, #tpu.memory_space<vmem>>, vector<32x32xf32>
    %cst_7 = arith.constant dense<0.000000e+00> : vector<32x2xf32>
    %8 = tpu.matmul %7, %6, %cst_7 {dimension_numbers = #tpu.dot_dimension_numbers<[1], [0], [0], [1], [0, 0, 1, 1], [], []>} : vector<32x32xf32>, vector<32x2xf32>, vector<32x2xf32> -> vector<32x2xf32>
    %c0_8 = arith.constant 0 : index
    %c0_9 = arith.constant 0 : index
    %9 = vector.load %arg5[%c0_8, %c0_9] : memref<32x1xf32, #tpu.memory_space<vmem>>, vector<32x1xf32>
    %10 = vector.broadcast %9 : vector<32x1xf32> to vector<32x2xf32>
    %11 = arith.addf %8, %10 : vector<32x2xf32>
    %12 = math.tanh %11 : vector<32x2xf32>
    %c0_10 = arith.constant 0 : index
    %c0_11 = arith.constant 0 : index
    %13 = vector.load %arg6[%c0_10, %c0_11] : memref<8x32xf32, #tpu.memory_space<vmem>>, vector<8x32xf32>
    %cst_12 = arith.constant dense<0.000000e+00> : vector<8x2xf32>
    %14 = tpu.matmul %13, %12, %cst_12 {dimension_numbers = #tpu.dot_dimension_numbers<[1], [0], [0], [1], [0, 0, 1, 1], [], []>} : vector<8x32xf32>, vector<32x2xf32>, vector<8x2xf32> -> vector<8x2xf32>
    %c0_13 = arith.constant 0 : index
    %c0_14 = arith.constant 0 : index
    %15 = vector.load %arg7[%c0_13, %c0_14] : memref<8x1xf32, #tpu.memory_space<vmem>>, vector<8x1xf32>
    %16 = vector.broadcast %15 : vector<8x1xf32> to vector<8x2xf32>
    %17 = arith.addf %14, %16 : vector<8x2xf32>
    %cst_15 = arith.constant dense<0xFF800000> : vector<2xf32>
    %18 = vector.multi_reduction <maximumf>, %17, %cst_15 [0] : vector<8x2xf32> to vector<2xf32>
    %19 = vector.shape_cast %18 : vector<2xf32> to vector<1x2xf32>
    %20 = vector.broadcast %19 : vector<1x2xf32> to vector<8x2xf32>
    %21 = arith.subf %17, %20 : vector<8x2xf32>
    %22 = math.exp %21 : vector<8x2xf32>
    %cst_16 = arith.constant dense<0.000000e+00> : vector<2xf32>
    %23 = vector.multi_reduction <add>, %22, %cst_16 [0] : vector<8x2xf32> to vector<2xf32>
    %24 = vector.shape_cast %23 : vector<2xf32> to vector<1x2xf32>
    %25 = tpu.reciprocal %24 {approx = true} : vector<1x2xf32> -> vector<1x2xf32>
    %26 = arith.mulf %24, %25 : vector<1x2xf32>
    %cst_17 = arith.constant 2.000000e+00 : f32
    %27 = vector.broadcast %cst_17 : f32 to vector<1x2xf32>
    %28 = arith.subf %27, %26 : vector<1x2xf32>
    %29 = arith.mulf %25, %28 : vector<1x2xf32>
    %30 = vector.broadcast %29 : vector<1x2xf32> to vector<8x2xf32>
    %31 = arith.mulf %22, %30 : vector<8x2xf32>
    %c0_18 = arith.constant 0 : index
    %c0_19 = arith.constant 0 : index
    %32 = vector.load %arg8[%c0_18, %c0_19] : memref<8x2xf32, #tpu.memory_space<vmem>>, vector<8x2xf32>
    tpu.vector_store %arg8[%c0_18, %c0_19], %31 {strides = array<i32>} : memref<8x2xf32, #tpu.memory_space<vmem>>, vector<8x2xf32>,
    return
  }
  func.func @transform_0(%arg0: i32) -> (i32, i32) {
    %c0_i32 = arith.constant 0 : i32
    %c0_i32_0 = arith.constant 0 : i32
    return %c0_i32, %arg0 : i32, i32
  }
  func.func @transform_1(%arg0: i32) -> (i32, i32) {
    %c0_i32 = arith.constant 0 : i32
    %c0_i32_0 = arith.constant 0 : i32
    %c0_i32_1 = arith.constant 0 : i32
    return %c0_i32, %c0_i32_0 : i32, i32
  }
  func.func @transform_2(%arg0: i32) -> (i32, i32) {
    %c0_i32 = arith.constant 0 : i32
    %c0_i32_0 = arith.constant 0 : i32
    %c0_i32_1 = arith.constant 0 : i32
    return %c0_i32, %c0_i32_0 : i32, i32
  }
  func.func @transform_3(%arg0: i32) -> (i32, i32) {
    %c0_i32 = arith.constant 0 : i32
    %c0_i32_0 = arith.constant 0 : i32
    %c0_i32_1 = arith.constant 0 : i32
    return %c0_i32, %c0_i32_0 : i32, i32
  }
  func.func @transform_4(%arg0: i32) -> (i32, i32) {
    %c0_i32 = arith.constant 0 : i32
    %c0_i32_0 = arith.constant 0 : i32
    %c0_i32_1 = arith.constant 0 : i32
    return %c0_i32, %c0_i32_0 : i32, i32
  }
  func.func @transform_5(%arg0: i32) -> (i32, i32) {
    %c0_i32 = arith.constant 0 : i32
    %c0_i32_0 = arith.constant 0 : i32
    %c0_i32_1 = arith.constant 0 : i32
    return %c0_i32, %c0_i32_0 : i32, i32
  }
  func.func @transform_6(%arg0: i32) -> (i32, i32) {
    %c0_i32 = arith.constant 0 : i32
    %c0_i32_0 = arith.constant 0 : i32
    %c0_i32_1 = arith.constant 0 : i32
    return %c0_i32, %c0_i32_0 : i32, i32
  }
  func.func @transform_7(%arg0: i32) -> (i32, i32) {
    %c0_i32 = arith.constant 0 : i32
    %c0_i32_0 = arith.constant 0 : i32
    return %c0_i32, %arg0 : i32, i32
  }
}

</mosaic_0001>

<bundles_post_ra>
// kernel: tpu_custom_call.1
= control target key start
LH: loop header
LB: loop body
LE: loop exit
PB: predicated region body
PF: predicated region fallthrough
CT: control target
= control target key end

     0   :  { %vm73_vm0 = vcmask 1042432   ;;  %v286_v2 = vmov 0   ;;  %vm60_vm1 = vcmask 351232   ;;  %vm138_vm2 = vcmask 261120   ;;  %s414_s0 = inlined_call_operand.vmem [shape: f32[43,2], index: 0, kind: input, shape index: {}]   ;;  %s415_s2 = inlined_call_operand.vmem [shape: f32[32,1], index: 2, kind: input, shape index: {}]   ;;  %s416_s1 = inlined_call_operand.vmem [shape: f32[32,43], index: 1, kind: input, shape index: {}]   ;;  %s417_s4 = inlined_call_operand.vmem [shape: f32[32,1], index: 4, kind: input, shape index: {}]   ;;  %s418_s3 = inlined_call_operand.vmem [shape: f32[32,32], index: 3, kind: input, shape index: {}]   ;;  %s419_s6 = inlined_call_operand.vmem [shape: f32[8,1], index: 6, kind: input, shape index: {}]   ;;  %s420_s5 = inlined_call_operand.vmem [shape: f32[8,32], index: 5, kind: input, shape index: {}]   ;;  %s421_s7 = inlined_call_operand.vmem [shape: f32[8,2], index: 7, kind: output, shape index: {}]  }
   0x1   :  { %v31_v0 = vld [vmem:[%s414_s0 + $0x28] sm:$0x7]  ;;  %v30_v1 = vld [vmem:[%s414_s0 + $0x20] sm:$0xff]  ;;  %263 = vset.pattern.permute.xlu0 %v286_v2  ;;  %264 = vset.pattern.permute.xlu1 %v286_v2  ;;  %v29_v3 = vld [vmem:[%s414_s0 + $0x18] sm:$0xff]  ;;  %vm214_vm3 = vcmask 15360  }
   0x2   :  { %252 = vmatpush.msk.msra.mxu3 %vm73_vm0, %v31_v0  ;;  %242 = vmatpush.msk.msra.mxu0 %vm73_vm0, %v31_v0  ;;  %v39_v4 = vld [vmem:[%s415_s2 + $0x18] sm:$0xff]  ;;  %v37_v5 = vld [vmem:[%s415_s2 + $0x8] sm:$0xff]  ;;  %v28_v6 = vld [vmem:[%s414_s0 + $0x10] sm:$0xff] }
   0x3   :  { %265 = vset.pattern.permute.xlu2 %v286_v2  ;;  %57 = vperm.xlu0 %263, %v39_v4   ;;  %v27_v7 = vld [vmem:[%s414_s0 + $0x8] sm:$0xff]  ;;  %v26_v8 = vld [vmem:[%s414_s0] sm:$0xff]  ;;  %v34_v9 = vld [vmem:[%s416_s1 + $0x10] sm:$0xff] }
   0x4   :  { %253 = vmatpush.msra.mxu3 %v30_v1  ;;  %88 = vmatpush.msra.mxu0 %v30_v1  ;;  %v32_v10 = vld [vmem:[%s416_s1] sm:$0xff]  ;;  %v38_v11 = vld [vmem:[%s415_s2 + $0x10] sm:$0xff]  ;;  %v35_v13 = vld [vmem:[%s416_s1 + $0x18] sm:$0xff] }
   0x5   :  { %47 = vperm.xlu1 %264, %v37_v5   ;;  %v36_v12 = vld [vmem:[%s415_s2] sm:$0xff]  ;;  %v33_v14 = vld [vmem:[%s416_s1 + $0x8] sm:$0xff]  ;;  %v117_v26 = vld [vmem:[%s417_s4 + $0x18] sm:$0xff] }
   0x6   :  { %254 = vmatpush.msra.mxu3 %v29_v3  ;;  %89 = vmatpush.msra.mxu0 %v29_v3  ;;  %v115_v15 = vld [vmem:[%s417_s4 + $0x8] sm:$0xff]  ;;  %v114_v16 = vld [vmem:[%s417_s4] sm:$0xff]  ;;  %v116_v30 = vld [vmem:[%s417_s4 + $0x10] sm:$0xff] }
   0x7   :  { %135 = vperm.xlu2 %265, %v117_v26   ;;  %v110_v34 = vld [vmem:[%s418_s3] sm:$0xff]  ;;  %v113_v35 = vld [vmem:[%s418_s3 + $0x18] sm:$0xff]  ;;  %v111_v38 = vld [vmem:[%s418_s3 + $0x8] sm:$0xff] }
   0x8   :  { %255 = vmatpush.msra.mxu3 %v28_v6  ;;  %90 = vmatpush.msra.mxu0 %v28_v6  ;;  %v185_v37 = vld [vmem:[%s419_s6] sm:$0xff]  ;;  %v112_v39 = vld [vmem:[%s418_s3 + $0x10] sm:$0xff] }
   0x9   :  { %v184_v55 = vld [vmem:[%s420_s5] sm:$0xff] }
   0xa   :  { %256 = vmatpush.msra.mxu3 %v27_v7  ;;  %91 = vmatpush.msra.mxu0 %v27_v7 }
   0xb   :  { %52 = vperm.xlu0 %263, %v38_v11  }
   0xc   :  { %257 = vmatpush.msra.mxu3 %v26_v8  ;;  %92 = vmatpush.msra.mxu0 %v26_v8 }
   0xd   :  { %245 = vmatmul.msk.f32.vlgmr.msra.gmra.mxu3 %vm60_vm1, %v34_v9  ;;  %243 = vmatmul.msk.f32.vlgmr.msra.gmra.mxu0 %vm60_vm1, %v32_v10 }
   0xe   :  { %42 = vperm.xlu1 %264, %v36_v12  }
   0xf   :  { %130 = vperm.xlu2 %265, %v116_v30  }
  0x13   :  { %125 = vperm.xlu0 %263, %v115_v15  }
  0x15   :  { %246 = vmatmul.msk.f32.gmra.mxu3 %vm60_vm1, %v35_v13  ;;  %244 = vmatmul.msk.f32.gmra.mxu0 %vm60_vm1, %v33_v14 }
  0x16   :  { %120 = vperm.xlu1 %264, %v114_v16  }
  0x17   :  { %188 = vperm.xlu2 %265, %v185_v37  }
  0x61   :  { %v136_v41 = vpop.permute.xlu2 %135 }
  0x69   :  { %v131_v47 = vpop.permute.xlu2 %130 }
  0x71   :  { %v189_v57 = vpop.permute.xlu2 %188 }
  0x75   :  { %v58_v17 = vpop.permute.xlu0 %57 }
  0x77   :  { %v48_v20 = vpop.permute.xlu1 %47 }
  0x7d   :  { %v53_v21 = vpop.permute.xlu0 %52 }
  0x80   :  { %v43_v28 = vpop.permute.xlu1 %42 }
  0x85   :  { %v126_v46 = vpop.permute.xlu0 %125 }
  0x88   :  { %v121_v51 = vpop.permute.xlu1 %120 }
  0x8a   :  { %v94_v18 = vpop.f32.mrf.mxu0 }
  0x8b   :  { %v95_v29 = vadd.f32 %v94_v18, %v43_v28 }
  0x90   :  { %v100_v19 = vpop.f32.mrf.mxu3 }
  0x91   :  { %v101_v24 = vadd.f32 %v100_v19, %v53_v21 }
  0x92   :  { %v97_v22 = vpop.f32.mrf.mxu0 }
  0x93   :  { %v98_v27 = vadd.f32 %v97_v22, %v48_v20 }
  0x98   :  { %v103_v23 = vpop.f32.mrf.mxu3 }
  0x99   :  { %v104_v25 = vadd.f32 %v103_v23, %v58_v17 }
  0x9b   :  { %266 = vtanh.f32 %v104_v25 }
  0x9c   :  { %268 = vtanh.f32 %v101_v24 }
  0x9d   :  { %270 = vtanh.f32 %v98_v27 }
  0x9e   :  { %272 = vtanh.f32 %v95_v29 }
  0xa1   :  { %v267_v31 = vpop.eup %266 }
  0xa2   :  { %163 = vmatpush.msra.mxu1 %v267_v31  ;;  %258 = vmatpush.msra.mxu2 %v267_v31  ;;  %v269_v32 = vpop.eup %268 }
  0xa3   :  { %v271_v33 = vpop.eup %270 }
  0xa4   :  { %164 = vmatpush.msra.mxu1 %v269_v32  ;;  %259 = vmatpush.msra.mxu2 %v269_v32  ;;  %v273_v36 = vpop.eup %272 }
  0xa6   :  { %165 = vmatpush.msra.mxu1 %v271_v33  ;;  %260 = vmatpush.msra.mxu2 %v271_v33 }
  0xa8   :  { %166 = vmatpush.msra.mxu1 %v273_v36  ;;  %261 = vmatpush.msra.mxu2 %v273_v36 }
  0xa9   :  { %247 = vmatmul.msk.f32.vlgmr.msra.gmra.mxu1 %vm138_vm2, %v110_v34  ;;  %250 = vmatmul.msk.f32.vlgmr.msra.gmra.mxu2 %vm138_vm2, %v113_v35 }
  0xb1   :  { %248 = vmatmul.msk.f32.gmra.mxu1 %vm138_vm2, %v111_v38 }
  0xb9   :  { %249 = vmatmul.msk.f32.gmra.mxu1 %vm138_vm2, %v112_v39 }
 0x126   :  { %v168_v40 = vpop.f32.mrf.mxu1 }
 0x127   :  { %v169_v52 = vadd.f32 %v168_v40, %v121_v51 }
 0x12c   :  { %v177_v42 = vpop.f32.mrf.mxu2 }
 0x12d   :  { %v178_v43 = vadd.f32 %v177_v42, %v136_v41 }
 0x12e   :  { %v171_v44 = vpop.f32.mrf.mxu1 }
 0x12f   :  { %274 = vtanh.f32 %v178_v43  ;;  %v172_v49 = vadd.f32 %v171_v44, %v126_v46 }
 0x135   :  { %v275_v45 = vpop.eup %274 }
 0x136   :  { %v174_v48 = vpop.f32.mrf.mxu1  ;;  %206 = vmatpush.msrb.mxu2 %v275_v45 }
 0x137   :  { %v175_v50 = vadd.f32 %v174_v48, %v131_v47 }
 0x139   :  { %276 = vtanh.f32 %v175_v50 }
 0x13a   :  { %278 = vtanh.f32 %v172_v49 }
 0x13b   :  { %280 = vtanh.f32 %v169_v52 }
 0x13f   :  { %v277_v53 = vpop.eup %276 }
 0x140   :  { %207 = vmatpush.msrb.mxu2 %v277_v53  ;;  %v279_v54 = vpop.eup %278 }
 0x141   :  { %v281_v56 = vpop.eup %280 }
 0x142   :  { %208 = vmatpush.msrb.mxu2 %v279_v54 }
 0x144   :  { %209 = vmatpush.msrb.mxu2 %v281_v56 }
 0x145   :  { %251 = vmatmul.msk.f32.vlgmr.msrb.gmra.mxu2 %vm138_vm2, %v184_v55 }
 0x1c8   :  { %v211_v58 = vpop.f32.mrf.mxu2 }
 0x1c9   :  { %v212_v59 = vadd.f32 %v211_v58, %v189_v57 }
 0x1cb   :  { %v215_v60 = vsel %vm214_vm3, %v212_v59, -inf }
 0x1cc   :  { %v216_v61 = vrot.slane %v215_v60, 4 }
 0x1ce   :  { %v217_v62 = vmax.f32 %v215_v60, %v216_v61 }
 0x1d0   :  { %v218_v63 = vrot.slane %v217_v62, 2 }
 0x1d2   :  { %v219_v0 = vmax.f32 %v217_v62, %v218_v63 }
 0x1d4   :  { %v220_v1 = vrot.slane %v219_v0, 1 }
 0x1d6   :  { %v221_v2 = vmax.f32 %v219_v0, %v220_v1 }
 0x1d8   :  { %v222_v3 = vsub.f32 %v212_v59, %v221_v2 }
 0x1da   :  { %v223_v4 = vmul.f32 1.442695, %v222_v3 }
 0x1dc   :  { %282 = vpow2.f32 %v223_v4 }
 0x1e2   :  { %v283_v5 = vpop.eup %282 }
 0x1e3   :  { %v225_v6 = vsel %vm214_vm3, %v283_v5, 0.0 }
 0x1e4   :  { %v226_v7 = vrot.slane %v225_v6, 4 }
 0x1e6   :  { %v227_v8 = vadd.f32 %v226_v7, %v225_v6 }
 0x1e8   :  { %v228_v9 = vrot.slane %v227_v8, 2 }
 0x1ea   :  { %v229_v10 = vadd.f32 %v228_v9, %v227_v8 }
 0x1ec   :  { %v230_v11 = vrot.slane %v229_v10, 1 }
 0x1ee   :  { %v231_v12 = vadd.f32 %v230_v11, %v229_v10 }
 0x1f0   :  { %284 = vrcp.f32 %v231_v12 }
 0x1f6   :  { %v285_v13 = vpop.eup %284 }
 0x1f7   :  { %v233_v14 = vmul.f32 %v285_v13, %v231_v12 }
 0x1f9   :  { %v234_v15 = vsub.f32 2.0, %v233_v14 }
 0x1fb   :  { %v235_v16 = vmul.f32 %v285_v13, %v234_v15 }
 0x1fd   :  { %v236_v17 = vmul.f32 %v283_v5, %v235_v16 }
 0x1ff   :  { %237 = vst.msk [vmem:[%s421_s7] sm:$0xff] %vm214_vm3, %v236_v17 }

</bundles_post_ra>
